<compile_context>
chip_gen: v5e
topology: v5e:2x2
jax: 0.10.0
libtpu: 0.0.40
codegen_flags: <defaults>
</compile_context>

<pallas_src>
import math

import jax
import jax.numpy as jnp
from jax.experimental import pallas as pl
from jax.experimental.pallas import tpu as pltpu


_LANE = 128
_SUBLANE = {4: 8, 2: 16, 1: 32}          # dtype itemsize -> sublane multiple


def _round_up(x, m):
    return (x + m - 1) // m * m


# ---------------------------------------------------------------------------
# Kernels
# ---------------------------------------------------------------------------
def _expand_bias(bp_ref, bt, s, compact):
    """bias+pos table for one M tile (always f32)."""
    bp = bp_ref[...]
    if not compact:
        return bp                                           # already [bt*s, out_p]
    out_p = bp.shape[-1]
    return jnp.broadcast_to(bp[None], (bt, s, out_p)).reshape(bt * s, out_p)


def _make_proj_kernel(bt, s, compact_bp):
    """out = x @ W + (bias + pos), single K block."""
    def kernel(x_ref, w_ref, bp_ref, o_ref):
        y = jnp.dot(x_ref[...], w_ref[...], preferred_element_type=jnp.float32)
        o_ref[...] = (y + _expand_bias(bp_ref, bt, s, compact_bp)).astype(o_ref.dtype)
    return kernel


def _make_proj_kernel_ksplit(bt, s, compact_bp):
    """Same, with a K-reduction grid axis and an f32 VMEM accumulator."""
    def kernel(x_ref, w_ref, bp_ref, o_ref, acc_ref):
        k = pl.program_id(1)

        @pl.when(k == 0)
        def _init():
            acc_ref[...] = jnp.zeros_like(acc_ref)

        acc_ref[...] += jnp.dot(x_ref[...], w_ref[...],
                                preferred_element_type=jnp.float32)

        @pl.when(k == pl.num_programs(1) - 1)
        def _finalize():
            o_ref[...] = (acc_ref[...]
                          + _expand_bias(bp_ref, bt, s, compact_bp)).astype(o_ref.dtype)
    return kernel


# ---------------------------------------------------------------------------
# Capability / hardware probes (cached)
# ---------------------------------------------------------------------------
def _vmem_budget_bytes():
    """~75% of this generation's per-core VMEM (≈48 MiB v7x, ≈96 MiB v5e/v6e)."""
    try:
        cap = int(pltpu.get_tpu_info().vmem_capacity_bytes)
    except Exception:
        cap = 64 * 2**20                     # conservative (v7x-sized) fallback
    return int(0.75 * cap)


def _probe_copy_kernel(x_ref, o_ref):
    o_ref[...] = x_ref[...]


_SB_MODE_CACHE = []                          # [] = not probed yet


def _single_buffer_mode():
    """Return pl.Buffered(1) if this Pallas build honours BlockSpec.pipeline_mode
    (lets us single-buffer the grid-invariant weight / bias+pos operands, halving
    their VMEM footprint — matters most inside v7x's 64 MiB budget), else None."""
    if not _SB_MODE_CACHE:
        try:
            spec = pl.BlockSpec((8, _LANE), lambda i: (0, 0),
                                pipeline_mode=pl.Buffered(1))
            out = pl.pallas_call(
                _probe_copy_kernel,
                out_shape=jax.ShapeDtypeStruct((16, _LANE), jnp.float32),
                grid=(2,),
                in_specs=[spec],
                out_specs=pl.BlockSpec((8, _LANE), lambda i: (i, 0)),
            )(jnp.zeros((8, _LANE), jnp.float32))
            jax.block_until_ready(out)
            _SB_MODE_CACHE.append(pl.Buffered(1))
        except Exception:
            _SB_MODE_CACHE.append(None)      # fall back to default double buffering
    return _SB_MODE_CACHE[0]


# ---------------------------------------------------------------------------
# One-time parameter preparation
# ---------------------------------------------------------------------------
def prepare_params(params, dtype=jnp.bfloat16):
    """One-time prep: transpose, cast, lane-pad out_dim to 128, fold bias into pos.

    dtype: MXU compute dtype for the weight (activations are cast to match in the
    wrapper).  bf16 is the native fast path on v5e/v6e/v7x and halves HBM->VMEM
    traffic; pass jnp.float32 for bit-exact f32 results.  The bias+positional
    table is always kept in f32 (tiny, grid-invariant, added to the f32 acc).
    """
    proj_w = jnp.asarray(params["proj_w"])                          # [out_dim, in_dim]
    out_dim, _ = proj_w.shape
    out_p = _round_up(out_dim, _LANE)                               # lane-dense stores

    w_t = proj_w.T.astype(dtype)                                    # [in_dim, out_dim]
    bias_pos = (params["pos_encs"][0].astype(jnp.float32)
                + params["proj_b"].astype(jnp.float32)[None, :])    # [max_len, out_dim]
    if out_p != out_dim:
        w_t = jnp.pad(w_t, ((0, 0), (0, out_p - out_dim)))
        bias_pos = jnp.pad(bias_pos, ((0, 0), (0, out_p - out_dim)))
    # TODO(synk): in_dim is deliberately NOT padded (it would force a per-call
    # HBM pad copy of the activations); a non-128-multiple in_dim is legal since
    # the K block spans the full array dim.

    tok = None
    if params.get("cls_w", None) is not None:
        # learned_token(tensor([[1.]])) == cls_w @ [1.] == cls_w.T
        tok = jnp.asarray(params["cls_w"]).T.astype(jnp.float32)    # [1, out_dim]
    return {"w_t": w_t, "bias_pos": bias_pos, "tok": tok, "out_dim": out_dim}


# ---------------------------------------------------------------------------
# Tiling heuristics
# ---------------------------------------------------------------------------
def _pick_batch_tile(B, S, target_rows, sublane):
    """Pick batches-per-grid-step `bt` (and padded batch `b_pad`) such that:
       * the flattened block's second-to-last dim (bt*S) is sublane-aligned,
       * bt divides B whenever possible (no HBM pad copy of the activations),
       * bt*S is close to (at most) target_rows,
       * large problems get >= 2 (preferably an even number of) grid steps so
         dimension_semantics=("parallel",) can shard across v7x's 2 TensorCores.
    """
    align = sublane // math.gcd(S, sublane)      # min m with (m*S) % sublane == 0
    rows = B * S
    if rows <= target_rows:
        # Small problem: single step, unless it splits evenly into two aligned,
        # non-trivial halves (keeps both v7x cores busy).
        if B % (2 * align) == 0 and rows >= 512:
            return B // 2, B
        return B, B

    target_bt = max(align, (target_rows // S) // align * align)
    cands, d = set(), 1
    while d * d <= B:
        if B % d == 0:
            for c in (d, B // d):
                if c <= target_bt and (c % align == 0 or c == B):
                    cands.add(c)
        d += 1
    if cands:
        for c in sorted(cands, reverse=True):
            if (B // c) % 2 == 0:                # prefer an even number of steps
                return c, B
        return max(cands), B
    # No aligned divisor of B: fall back to an aligned bt with batch padding.
    bt = target_bt
    if bt >= B:
        return B, B
    return bt, _round_up(B, bt)
    # TODO(synk): for B==1 with a huge S the single block spans the whole
    # sequence; add an S-split (second M axis) if that ever exceeds VMEM.


def _pick_k_tile(in_dim, out_p, w_bytes, x_bytes, tile_rows, budget):
    """Largest K tile (multiple of 128 dividing in_dim) whose double-buffered
    weight+activation slabs fit in half the VMEM budget; None = no split."""
    if in_dim % _LANE != 0 or in_dim <= _LANE:
        return None
    best = None
    for tk in range(_LANE, in_dim, _LANE):
        if in_dim % tk:
            continue
        slab = 2 * tk * (out_p * w_bytes + tile_rows * x_bytes)
        if slab <= budget // 2:
            best = tk
    return best


# ---------------------------------------------------------------------------
# Wrapper
# ---------------------------------------------------------------------------
def ek_preprocess_nw(embeddings, prep, mask=None, *, target_rows=None, k_tile=None):
    """JAX/Pallas equivalent of EKPreprocessNW.forward.

    Args:
      embeddings: [B, S, in_dim].
      prep:       output of prepare_params().
      mask:       optional [B, S].
      target_rows: rows per grid step (None = derive from the VMEM budget).
      k_tile:     force a K-reduction tile (None = auto-trigger only when the
                  weight slab would blow the per-generation VMEM budget).

    Returns:
      [B, S, out_dim]                      if no class token,
      ([B, S+1, out_dim], mask_or_None)    if class token enabled.
    """
    B, S, in_dim = embeddings.shape
    w_t = prep["w_t"]                              # [in_dim, out_p]
    bias_pos = prep["bias_pos"]                    # [max_len, out_p], f32
    out_dim = prep["out_dim"]
    out_p = w_t.shape[1]
    assert w_t.shape[0] == in_dim, "prep['w_t'] in_dim mismatch"

    compute_dtype = w_t.dtype
    out_dtype = embeddings.dtype
    x_bytes = jnp.dtype(compute_dtype).itemsize
    w_bytes = x_bytes
    o_bytes = jnp.dtype(out_dtype).itemsize

    budget = _vmem_budget_bytes()
    sb = _single_buffer_mode()
    inv = {"pipeline_mode": sb} if sb is not None else {}
    w_bufs = 1 if sb is not None else 2

    # --- M tiling (dtype-aware sublane alignment; divisor-of-B preferred). ---
    sublane = max(_SUBLANE.get(x_bytes, 8), _SUBLANE.get(o_bytes, 8))
    if target_rows is None:
        per_row = 2 * (in_dim * x_bytes + out_p * o_bytes)
        fixed = w_bufs * in_dim * out_p * w_bytes + 2 * S * out_p * 4
        avail = max(budget // 2 - fixed, 8 * per_row)
        target_rows = int(min(4096, max(256, avail // per_row)))
    bt, b_pad = _pick_batch_tile(B, S, target_rows, sublane)
    tile_rows = bt * S
    m_steps = b_pad // bt

    x = embeddings
    if b_pad != B:                                  # rare: only if B has no aligned divisor
        x = jnp.pad(x, ((0, b_pad - B), (0, 0), (0, 0)))
    x2 = x.reshape(b_pad * S, in_dim)
    if x2.dtype != compute_dtype:
        # bf16 fast path: native MXU dtype + half the HBM->VMEM DMA for x.  In a
        # real model keep the upstream producer in bf16 so this cast fuses away.
        x2 = x2.astype(compute_dtype)

    # --- bias + positional encodings (always f32). --------------------------
    compact_bp = (bt == 1) or (S % 8 == 0)
    if compact_bp:
        bp = bias_pos[:S]                           # [S, out_p], broadcast in-kernel
    else:
        bp = jnp.tile(bias_pos[:S], (bt, 1))        # fallback: materialized per-tile table

    # --- optional K-reduction axis (v7x escape valve for large in_dim). -----
    tk = k_tile
    if tk is not None and (tk >= in_dim or in_dim % tk or tk % _LANE):
        tk = None
    if tk is None:
        est_full = (2 * tile_rows * in_dim * x_bytes
                    + 2 * tile_rows * out_p * o_bytes
                    + w_bufs * in_dim * out_p * w_bytes)
        if est_full > budget // 2:
            tk = _pick_k_tile(in_dim, out_p, w_bytes, x_bytes, tile_rows, budget)

    if tk is None:
        est = (2 * tile_rows * in_dim * x_bytes
               + 2 * tile_rows * out_p * o_bytes
               + w_bufs * in_dim * out_p * w_bytes
               + w_bufs * bp.size * 4)
        vmem_limit = int(min(budget, max(32 * 2**20, 1.35 * est)))
        out2 = pl.pallas_call(
            _make_proj_kernel(bt, S, compact_bp),
            out_shape=jax.ShapeDtypeStruct((b_pad * S, out_p), out_dtype),
            grid=(m_steps,),
            in_specs=[
                pl.BlockSpec((tile_rows, in_dim), lambda i: (i, 0)),
                pl.BlockSpec((in_dim, out_p), lambda i: (0, 0), **inv),   # grid-invariant
                pl.BlockSpec(bp.shape, lambda i: (0, 0), **inv),          # grid-invariant
            ],
            out_specs=pl.BlockSpec((tile_rows, out_p), lambda i: (i, 0)),
            compiler_params=pltpu.CompilerParams(
                dimension_semantics=("parallel",),
                vmem_limit_bytes=vmem_limit),
        )(x2, w_t, bp)
    else:
        k_steps = in_dim // tk
        est = (2 * tile_rows * tk * x_bytes
               + 2 * tile_rows * out_p * o_bytes
               + 2 * tk * out_p * w_bytes
               + w_bufs * bp.size * 4
               + tile_rows * out_p * 4)             # f32 accumulator scratch
        vmem_limit = int(min(budget, max(32 * 2**20, 1.35 * est)))
        out2 = pl.pallas_call(
            _make_proj_kernel_ksplit(bt, S, compact_bp),
            out_shape=jax.ShapeDtypeStruct((b_pad * S, out_p), out_dtype),
            grid=(m_steps, k_steps),
            in_specs=[
                pl.BlockSpec((tile_rows, tk), lambda i, k: (i, k)),
                pl.BlockSpec((tk, out_p), lambda i, k: (k, 0)),
                pl.BlockSpec(bp.shape, lambda i, k: (0, 0), **inv),       # grid-invariant
            ],
            out_specs=pl.BlockSpec((tile_rows, out_p), lambda i, k: (i, 0)),
            scratch_shapes=[pltpu.VMEM((tile_rows, out_p), jnp.float32)],
            compiler_params=pltpu.CompilerParams(
                dimension_semantics=("parallel", "arbitrary"),
                vmem_limit_bytes=vmem_limit),
        )(x2, w_t, bp)

    out = out2.reshape(b_pad, S, out_p)
    if b_pad != B:
        out = out[:B]
    if out_p != out_dim:
        out = out[..., :out_dim]    # drop lane padding (no-op when out_dim % 128 == 0)

    # --- class token / mask prepend: cheap XLA glue, kept out of the kernel. -
    if prep["tok"] is not None:
        tok = jnp.broadcast_to(
            prep["tok"].astype(out.dtype).reshape(1, 1, out_dim), (B, 1, out_dim))
        out = jnp.concatenate([tok, out], axis=1)
        if mask is not None:
            prepend = jnp.zeros((B, 1), dtype=mask.dtype)
            mask = jnp.concatenate([prepend, mask], axis=1)
        return out, mask
    return out


# ---------------------------------------------------------------------------
# Deterministic parameter construction (mirrors EKPreprocessNW.__init__)
# ---------------------------------------------------------------------------
def make_params(key, max_len, in_dim, out_dim, cls_token):
    k1, k2, k3, _ = jax.random.split(key, 4)
    lim = 1.0 / math.sqrt(in_dim)
    proj_w = jax.random.uniform(k1, (out_dim, in_dim), jnp.float32, -lim, lim)
    proj_b = jax.random.uniform(k2, (out_dim,), jnp.float32, -lim, lim)

    cls_w = None
    if cls_token:
        cls_w = jax.random.uniform(k3, (out_dim, 1), jnp.float32, -1.0, 1.0)

    pos = jnp.arange(max_len, dtype=jnp.float32)[:, None]            # [L, 1]
    div_term = jnp.exp(jnp.arange(0, out_dim, 2, dtype=jnp.float32)
                       * (-math.log(10000.0) / out_dim))             # [out_dim//2]
    pe = jnp.zeros((max_len, out_dim), jnp.float32)
    pe = pe.at[:, 0::2].set(jnp.sin(pos * div_term))
    pe = pe.at[:, 1::2].set(jnp.cos(pos * div_term))
    pe = (pe * 0.5)[None, :, :]                                      # [1, L, out_dim]

    return {"proj_w": proj_w, "proj_b": proj_b, "pos_encs": pe, "cls_w": cls_w}


# ---------------------------------------------------------------------------
# Pure-JAX reference (for correctness check)
# ---------------------------------------------------------------------------
def ek_preprocess_ref(x, params, mask=None):
    B, S, _ = x.shape
    y = jnp.einsum("bsi,oi->bso", x, params["proj_w"]) + params["proj_b"]
    y = y + params["pos_encs"][:, :S]
    if params.get("cls_w", None) is not None:
        tok = params["cls_w"].T[None, :, :]
        tok = jnp.tile(tok, (B, 1, 1))
        y = jnp.concatenate([tok, y], axis=1)
        if mask is not None:
            mask = jnp.concatenate([jnp.zeros((B, 1), jnp.float32), mask], axis=1)
        return y, mask
    return y


# ---------------------------------------------------------------------------
if __name__ == "__main__":
    B, S, in_dim, out_dim, max_len = 2, 8, 32, 32, 16

    key = jax.random.PRNGKey(0)
    kx, km, kp = jax.random.split(key, 3)
    x = jax.random.normal(kx, (B, S, in_dim), jnp.float32)
    mask = (jax.random.uniform(km, (B, S)) > 0.5).astype(jnp.float32)

    # --- exact f32 path, cls_token=True ------------------------------------
    params_cls = make_params(kp, max_len, in_dim, out_dim, cls_token=True)
    prep_cls = prepare_params(params_cls, dtype=jnp.float32)
    out_cls, mask_out = ek_preprocess_nw(x, prep_cls, mask)
    out_cls = jax.block_until_ready(out_cls)
    mask_out = jax.block_until_ready(mask_out)
    ref_cls, ref_mask = ek_preprocess_ref(x, params_cls, mask)
    assert out_cls.shape == (B, S + 1, out_dim)
    assert mask_out.shape == (B, S + 1)
    assert jnp.allclose(out_cls, ref_cls, atol=1e-5, rtol=1e-5)
    assert jnp.allclose(mask_out, ref_mask)

    # --- exact f32 path, cls_token=False -----------------------------------
    params_nocls = make_params(kp, max_len, in_dim, out_dim, cls_token=False)
    prep_nocls = prepare_params(params_nocls, dtype=jnp.float32)
    out_plain = jax.block_until_ready(ek_preprocess_nw(x, prep_nocls))
    ref_plain = ek_preprocess_ref(x, params_nocls)
    assert out_plain.shape == (B, S, out_dim)
    assert jnp.allclose(out_plain, ref_plain, atol=1e-5, rtol=1e-5)

    # --- production bf16 fast path (prepare_params default dtype) ----------
    prep_bf16 = prepare_params(params_nocls)          # bf16 weight, f32 bias+pos
    out_bf16 = jax.block_until_ready(ek_preprocess_nw(x, prep_bf16))
    assert out_bf16.shape == (B, S, out_dim)
    assert jnp.allclose(out_bf16, ref_plain, atol=3e-2, rtol=3e-2)

    # --- K-reduction grid axis (forced; v7x large-in_dim escape valve) -----
    in_dim_big = 256
    xk = jax.random.normal(kx, (B, S, in_dim_big), jnp.float32)
    params_k = make_params(kp, max_len, in_dim_big, out_dim, cls_token=False)
    prep_k = prepare_params(params_k, dtype=jnp.float32)
    out_k = jax.block_until_ready(ek_preprocess_nw(xk, prep_k, k_tile=128))
    ref_k = ek_preprocess_ref(xk, params_k)
    assert jnp.allclose(out_k, ref_k, atol=1e-4, rtol=1e-4)

    print("KERNEL_OK")
</pallas_src>

<mosaic_0001>
module attributes {stable_mosaic.version = 11 : i64} {
  func.func @_probe_copy_kernel(%arg0: i32, %arg1: memref<8x128xf32, #tpu.memory_space<vmem>>, %arg2: memref<8x128xf32, #tpu.memory_space<vmem>>) attributes {dimension_semantics = [#tpu.dimension_semantics<arbitrary>], iteration_bounds = array<i64: 2>, scalar_prefetch = 0 : i64, scratch_operands = 0 : i64, tpu.core_type = #tpu.core_type<tc>, window_params = [{pipeline_mode = #tpu.pipeline_mode<synchronous>, transform_indices = @transform_0, window_bounds = array<i64: 8, 128>}, {transform_indices = @transform_1, window_bounds = array<i64: 8, 128>}]} {
    %c0 = arith.constant 0 : index
    %c0_0 = arith.constant 0 : index
    %0 = vector.load %arg1[%c0, %c0_0] : memref<8x128xf32, #tpu.memory_space<vmem>>, vector<8x128xf32>
    %c0_1 = arith.constant 0 : index
    %c0_2 = arith.constant 0 : index
    %1 = vector.load %arg2[%c0_1, %c0_2] : memref<8x128xf32, #tpu.memory_space<vmem>>, vector<8x128xf32>
    tpu.vector_store %arg2[%c0_1, %c0_2], %0 {strides = array<i32>} : memref<8x128xf32, #tpu.memory_space<vmem>>, vector<8x128xf32>,
    return
  }
  func.func @transform_0(%arg0: i32) -> (i32, i32) {
    %c0_i32 = arith.constant 0 : i32
    %c0_i32_0 = arith.constant 0 : i32
    %c0_i32_1 = arith.constant 0 : i32
    return %c0_i32, %c0_i32_0 : i32, i32
  }
  func.func @transform_1(%arg0: i32) -> (i32, i32) {
    %c0_i32 = arith.constant 0 : i32
    %c0_i32_0 = arith.constant 0 : i32
    return %arg0, %c0_i32 : i32, i32
  }
}

module attributes {stable_mosaic.version = 11 : i64} {
  func.func @kernel(%arg0: i32, %arg1: memref<16x32xf32, #tpu.memory_space<vmem>>, %arg2: memref<32x128xf32, #tpu.memory_space<vmem>>, %arg3: memref<8x128xf32, #tpu.memory_space<vmem>>, %arg4: memref<16x128xf32, #tpu.memory_space<vmem>>) attributes {dimension_semantics = [#tpu.dimension_semantics<parallel>], iteration_bounds = array<i64: 1>, scalar_prefetch = 0 : i64, scratch_operands = 0 : i64, tpu.core_type = #tpu.core_type<tc>, window_params = [{transform_indices = @transform_0, window_bounds = array<i64: 16, 32>}, {pipeline_mode = #tpu.pipeline_mode<synchronous>, transform_indices = @transform_1, window_bounds = array<i64: 32, 128>}, {pipeline_mode = #tpu.pipeline_mode<synchronous>, transform_indices = @transform_2, window_bounds = array<i64: 8, 128>}, {transform_indices = @transform_3, window_bounds = array<i64: 16, 128>}]} {
    %c0 = arith.constant 0 : index
    %c0_0 = arith.constant 0 : index
    %0 = vector.load %arg1[%c0, %c0_0] : memref<16x32xf32, #tpu.memory_space<vmem>>, vector<16x32xf32>
    %c0_1 = arith.constant 0 : index
    %c0_2 = arith.constant 0 : index
    %1 = vector.load %arg2[%c0_1, %c0_2] : memref<32x128xf32, #tpu.memory_space<vmem>>, vector<32x128xf32>
    %cst = arith.constant dense<0.000000e+00> : vector<16x128xf32>
    %2 = tpu.matmul %0, %1, %cst {dimension_numbers = #tpu.dot_dimension_numbers<[1], [0], [0], [1], [0, 0, 1, 1], [], []>} : vector<16x32xf32>, vector<32x128xf32>, vector<16x128xf32> -> vector<16x128xf32>
    %c0_3 = arith.constant 0 : index
    %c0_4 = arith.constant 0 : index
    %3 = vector.load %arg3[%c0_3, %c0_4] : memref<8x128xf32, #tpu.memory_space<vmem>>, vector<8x128xf32>
    %4 = vector.shape_cast %3 : vector<8x128xf32> to vector<1x8x128xf32>
    %5 = vector.shape_cast %4 : vector<1x8x128xf32> to vector<1x8x128xf32>
    %6 = vector.broadcast %5 : vector<1x8x128xf32> to vector<2x8x128xf32>
    %7 = vector.shape_cast %6 : vector<2x8x128xf32> to vector<16x128xf32>
    %8 = arith.addf %2, %7 : vector<16x128xf32>
    %c0_5 = arith.constant 0 : index
    %c0_6 = arith.constant 0 : index
    %9 = vector.load %arg4[%c0_5, %c0_6] : memref<16x128xf32, #tpu.memory_space<vmem>>, vector<16x128xf32>
    tpu.vector_store %arg4[%c0_5, %c0_6], %8 {strides = array<i32>} : memref<16x128xf32, #tpu.memory_space<vmem>>, vector<16x128xf32>,
    return
  }
  func.func @transform_0(%arg0: i32) -> (i32, i32) {
    %c0_i32 = arith.constant 0 : i32
    %c0_i32_0 = arith.constant 0 : i32
    return %arg0, %c0_i32 : i32, i32
  }
  func.func @transform_1(%arg0: i32) -> (i32, i32) {
    %c0_i32 = arith.constant 0 : i32
    %c0_i32_0 = arith.constant 0 : i32
    %c0_i32_1 = arith.constant 0 : i32
    return %c0_i32, %c0_i32_0 : i32, i32
  }
  func.func @transform_2(%arg0: i32) -> (i32, i32) {
    %c0_i32 = arith.constant 0 : i32
    %c0_i32_0 = arith.constant 0 : i32
    %c0_i32_1 = arith.constant 0 : i32
    return %c0_i32, %c0_i32_0 : i32, i32
  }
  func.func @transform_3(%arg0: i32) -> (i32, i32) {
    %c0_i32 = arith.constant 0 : i32
    %c0_i32_0 = arith.constant 0 : i32
    return %arg0, %c0_i32 : i32, i32
  }
}

</mosaic_0001>

<bundles_post_ra>
// kernel: tpu_custom_call.1
= control target key start
LH: loop header
LB: loop body
LE: loop exit
PB: predicated region body
PF: predicated region fallthrough
CT: control target
= control target key end

     0   :  { %6 = vsyncpa [#allocation3], 0  ;;  %s440_s0 = inlined_call_operand.hbm [shape: f32[8,128], index: 0, kind: input, shape index: {}]   ;;  %s441_s1 = inlined_call_operand.hbm [shape: f32[16,128], index: 1, kind: output, shape index: {}]  }
   0x1   :  { %7 = vsyncpa [#allocation4], 0 }
   0x2   :  { %9 = vsyncpa [#allocation4 + $0x1], 0  ;;  %s356_s6 = smov 0   ;;  %s358_s7 = smov 0  }
   0x3   :  { %s360_s8 = smov 0   ;;  %s362_s9 = smov 0  }
   0x4 LB: > { %s377_s10 = sadd.s32 4294967295, %s343_s9   ;;  %s187_s11 = sadd.s32 4294967294, %s343_s9   ;;  %s343_s9 = sphi %s362_s9, %s447_s9   ;;  %s339_s8 = sphi %s360_s8, %s446_s8   ;;  %s335_s7 = sphi %s358_s7, %s445_s7   ;;  %s331_s6 = sphi %s356_s6, %s444_s6  }
   0x5   : > { %s381_s12 = sadd.s32 1, %s343_s9   ;;  %s43_s13 = sadd.s32 1, %s339_s8 }
   0x6   : > { %s40_s14 = ssub.s32 %s343_s9, %s381_s12  ;;  %p53_p0 = scmp.ne.s32.totalorder %s339_s8, %s335_s7 }
   0x7   : > { %p41_p1 = scmp.eq.s32.totalorder %s40_s14, 0  ;;  %p54_p2 = scmp.eq.s32.totalorder %s377_s10, 1 }
   0x8   : > { %p59_p3 = scmp.ne.s32.totalorder %s335_s7, %s331_s6  ;;  %p60_p4 = scmp.eq.s32.totalorder %s187_s11, 1 }
   0x9   : > { %s392_s15 = scalar_select %p41_p1, %s339_s8, %s43_s13  }
   0xa   : > { %p394_p5 = por %p54_p2, %p53_p0  ;;  %p398_p6 = por %p60_p4, %p59_p3 }
   0xb   : > { %p188_p7 = scmp.ge.s32.totalorder %s343_s9, 1  ;;  %p67_p8 = scmp.lt.s32.totalorder %s343_s9, 3 }
   0xc   : > { %p211_p9 = scmp.eq.s32.totalorder %s377_s10, 0  ;;  %s79_s20 = sshll.u32 %s440_s0, 4  ;;  %s80_s20 = int_to_ptr.hbm [resolvable:$true] %s79_s20 }
   0xd   : > { %p68_p10 = pnand %p188_p7, %p67_p8  ;;  %s345_s21 = smov [#allocation2]  }
   0xe   : > { %s81_s22 = sshll.u32 %s345_s21, 4  ;;  %s82_s22 = int_to_ptr.vmem [resolvable:$true] %s81_s22 }
   0xf   : > { %p203_p11 = pneg %p68_p10  ;;  %94 = sbr.rel (%p68_p10) target bundleno = 37 (0x25), region = 24 }
  0x11   : > { %p204_p12 = pnand %p211_p9, %p203_p11 }
  0x13   : > { %206 = dma.hbm_to_vmem [thread:$0]  (!%p204_p12), %s80_s20, 128, %s82_s22, [#allocation3]  }
  0x14   : > { %322 = dma.done.wait (%p211_p9), [#allocation3], 128  }
  0x15   : > { %324 = vsyncadd (%p211_p9), [#allocation3], 4294967168  ;;  %s107_s23 = sand.u32 1, %s335_s7   ;;  %s194_s24 = sshll.u32 %s377_s10, 3  ;;  %v110_v0 = vld [vmem:[#allocation2] sm:$0xff] }
  0x16   : > { %s192_s25 = sshll.u32 %s107_s23, 3  ;;  %s123_s28 = scalar_lea.hbm %s441_s1, %s194_s24 }
  0x17   : > { %s109_s29 = scalar_lea.vmem [#allocation5], %s192_s25  ;;  %s127_s2 = sshll.u32 %s123_s28, 4  ;;  %s128_s2 = int_to_ptr.hbm [resolvable:$true] %s127_s2 }
  0x18   : > { %s125_s30 = sshll.u32 %s109_s29, 4  ;;  %111 = vst [vmem:[%s109_s29] sm:$0xff] %v110_v0  ;;  %s113_s3 = scalar_lea.sflag [#allocation4], %s107_s23  ;;  %s126_s30 = int_to_ptr.vmem [resolvable:$true] %s125_s30 }
  0x19   : > { %s291_s4 = sshra.s32 %s128_s2, 4  ;;  %s297_s13 = scalar_lea.hbm %s441_s1, 16  ;;  %s292_s4 = int_to_ptr.hbm [resolvable:$true] %s291_s4 }
  0x1a   : > { %s293_s5 = scalar_lea.hbm %s292_s4, 8  ;;  %p298_p2 = scmp.lt.s32.totalorder %s292_s4, %s441_s1 }
  0x1b   : > { %p294_p13 = scmp.ne.s32.totalorder %s292_s4, %s293_s5  ;;  %p299_p3 = scmp.lt.s32.totalorder %s297_s13, %s293_s5 }
  0x1d   : > { %p295_p0 = pnand %p294_p13, %p394_p5  ;;  %p300_p4 = por %p299_p3, %p298_p2 }
  0x1f   : > { %p296_p1 = pneg %p295_p0 }
  0x21   : > { %p301_p7 = pnand %p300_p4, %p296_p1 }
  0x23   : > { %304 = shalt.err (!%p301_p7)
}
  0x24   : > { %201 = dma.vmem_to_hbm [thread:$0]  (%p394_p5), %s126_s30, 128, %s128_s2, %s113_s3  }
  0x25 PF: > { %p213_p8 = scmp.ge.s32.totalorder %s343_s9, 2  ;;  %s139_s19 = sand.u32 1, %s331_s6  }
  0x26   : > { %s140_s20 = scalar_lea.sflag [#allocation4], %s139_s19 }
  0x27   : > { %p208_p9 = pnand %p213_p8, %p398_p6 }
  0x29   : > { %p209_p10 = pneg %p208_p9 }
  0x2b   : > { %326 = dma.done.wait (%p209_p10), %s140_s20, 128  }
  0x2c   : > { %328 = vsyncadd (%p209_p10), %s140_s20, 4294967168  ;;  %p12_p11 = scmp.ge.s32.totalorder %s381_s12, 4   ;;  %s444_s6 = smov %s335_s7 }
  0x2d   : > { %s445_s7 = smov %s339_s8  ;;  %s446_s8 = smov %s392_s15 }
  0x2e   : > { %s447_s9 = smov %s381_s12  ;;  %14 = sbr.rel (!%p12_p11) target bundleno = 4 (0x4), region = 61 }
  0x33   :  { %146 = vsyncpa [#allocation3], 1 }
  0x34   :  { %148 = vsyncpa [#allocation3 + $0x1], 1 }
  0x35   :  { %149 = vsyncpa [#allocation4], 1 }
  0x36   :  { %151 = vsyncpa [#allocation4 + $0x1], 1 }

// kernel: tpu_custom_call.1
= control target key start
LH: loop header
LB: loop body
LE: loop exit
PB: predicated region body
PF: predicated region fallthrough
CT: control target
= control target key end

     0   :  { %8 = vsyncpa [#allocation3], 0  ;;  %s280_s0 = inlined_call_operand.hbm [shape: f32[16,32], index: 0, kind: input, shape index: {}]   ;;  %s281_s1 = inlined_call_operand.hbm [shape: f32[32,128], index: 1, kind: input, shape index: {}]   ;;  %s282_s2 = inlined_call_operand.hbm [shape: f32[8,128], index: 2, kind: input, shape index: {}]   ;;  %s283_s3 = inlined_call_operand.hbm [shape: f32[16,128], index: 3, kind: output, shape index: {}]  }
   0x1   :  { %9 = vsyncpa [#allocation6], 0 }
   0x2   :  { %10 = vsyncpa [#allocation4], 0  ;;  %s28_s14 = sshll.u32 %s281_s1, 4  ;;  %s233_s15 = smov [#allocation5]   ;;  %s29_s14 = int_to_ptr.hbm [resolvable:$true] %s28_s14 }
   0x3   :  { %s30_s16 = sshll.u32 %s233_s15, 4  ;;  %s15_s19 = sshll.u32 %s280_s0, 4  ;;  %s31_s16 = int_to_ptr.vmem [resolvable:$true] %s30_s16  ;;  %s16_s19 = int_to_ptr.hbm [resolvable:$true] %s15_s19 }
   0x4   :  { %s234_s20 = smov 128   ;;  %s235_s21 = smov 8  }
   0x5   :  { %36 = dma.hbm_to_vmem [thread:$0]  %s29_s14, 512, %s31_s16, [#allocation6], %s234_s20, %s234_s20, %s235_s21  }
   0x6   :  { %s236_s22 = smov [#allocation2]   ;;  %s42_s1 = sshll.u32 %s282_s2, 4  ;;  %s43_s1 = int_to_ptr.hbm [resolvable:$true] %s42_s1 }
   0x7   :  { %s17_s23 = sshll.u32 %s236_s22, 4  ;;  %s237_s0 = smov [#allocation7]   ;;  %s18_s23 = int_to_ptr.vmem [resolvable:$true] %s17_s23 }
   0x8   :  { %23 = dma.hbm_to_vmem [thread:$0]  %s16_s19, 256, %s18_s23, [#allocation3], %s234_s20, %s234_s20, %s235_s21  }
   0x9   :  { %s44_s26 = sshll.u32 %s237_s0, 4  ;;  %s45_s26 = int_to_ptr.vmem [resolvable:$true] %s44_s26 }
   0xa   :  { %47 = dma.hbm_to_vmem [thread:$0]  %s43_s1, 128, %s45_s26, [#allocation6]  }
   0xb   :  { %227 = dma.done.wait [#allocation3], 256  }
   0xc   :  { %228 = vsyncadd [#allocation3], 4294967040 }
   0xd   :  { %229 = dma.done.wait [#allocation6], 640  }
   0xe   :  { %230 = vsyncadd [#allocation6], 4294966656  ;;  %v65_v0 = vld [vmem:[#allocation5 + $0x18] sm:$0xff]  ;;  %v64_v1 = vld [vmem:[#allocation5 + $0x10] sm:$0xff]  ;;  %vm67_vm0 = vcmask 261120   ;;  %s238_s2 = smov [#allocation8]  }
   0xf   :  { %86 = vmatpush.msra.mxu0 %v65_v0  ;;  %121 = vmatpush.msra.mxu1 %v65_v0  ;;  %v63_v2 = vld [vmem:[#allocation5 + $0x8] sm:$0xff]  ;;  %v62_v3 = vld [vmem:[#allocation5] sm:$0xff]  ;;  %v60_v4 = vld [vmem:[#allocation2] sm:$0xff]  ;;  %s103_s27 = sshll.u32 %s238_s2, 4  ;;  %s105_s30 = sshll.u32 %s283_s3, 4  ;;  %s104_s27 = int_to_ptr.vmem [resolvable:$true] %s103_s27  ;;  %s106_s30 = int_to_ptr.hbm [resolvable:$true] %s105_s30 }
  0x10   :  { %v61_v5 = vld [vmem:[#allocation2 + $0x8] sm:$0xff]  ;;  %v66_v6 = vld [vmem:[#allocation7] sm:$0xff] }
  0x11   :  { %87 = vmatpush.msra.mxu0 %v64_v1  ;;  %122 = vmatpush.msra.mxu1 %v64_v1 }
  0x13   :  { %88 = vmatpush.msra.mxu0 %v63_v2  ;;  %123 = vmatpush.msra.mxu1 %v63_v2 }
  0x15   :  { %89 = vmatpush.msra.mxu0 %v62_v3  ;;  %124 = vmatpush.msra.mxu1 %v62_v3 }
  0x16   :  { %119 = vmatmul.msk.f32.vlgmr.msra.gmra.mxu0 %vm67_vm0, %v60_v4  ;;  %120 = vmatmul.msk.f32.vlgmr.msra.gmra.mxu1 %vm67_vm0, %v61_v5 }
  0x93   :  { %v91_v7 = vpop.f32.mrf.mxu0  ;;  %v94_v8 = vpop.f32.mrf.mxu1 }
  0x94   :  { %v92_v9 = vadd.f32 %v91_v7, %v66_v6  ;;  %v95_v10 = vadd.f32 %v94_v8, %v66_v6 }
  0x96   :  { %97 = vst [vmem:[#allocation8] sm:$0xff] %v92_v9 }
  0x97   :  { %98 = vst [vmem:[#allocation8 + $0x8] sm:$0xff] %v95_v10 }
  0x98   :  { %111 = dma.vmem_to_hbm [thread:$0]  %s104_s27, 256, %s106_s30, [#allocation4], %s234_s20, %s234_s20, %s235_s21  }
  0x99   :  { %231 = dma.done.wait [#allocation4], 256  }
  0x9a   :  { %232 = vsyncadd [#allocation4], 4294967040 }
  0x9b   :  { %116 = vsyncpa [#allocation3], 1 }
  0x9c   :  { %117 = vsyncpa [#allocation6], 1 }
  0x9d   :  { %118 = vsyncpa [#allocation4], 1 }

</bundles_post_ra>
